<compile_context>
chip_gen: v7x
topology: tpu7x:2x2x1
jax: 0.10.0
libtpu: 0.0.40
codegen_flags: <defaults>
</compile_context>

<pallas_src>
import jax
import jax.numpy as jnp
from jax import lax
from jax.experimental import pallas as pl
from jax.experimental.pallas import tpu as pltpu

# ---- module hyper-parameters (small, consistent with the reference) ---------
B = 2
HIDDEN = 32
N_CLASS = 8
NC_PAD = 128        # classes zero-padded to one full lane width (lane-dense I/O)
M = 0.4             # margin
R = 30.0            # scale r
T = 3               # g_func exponent
EPS = 1e-12         # F.normalize eps (clamps the L2 norm itself, like PyTorch)


# =============================================================================
# Fused kernel: converter Linear + row L2-normalize (deferred rsqrt scale) +
#               cosine matmul against pre-normalized class weights + g-func
#               margin + bias.  Single lane-dense logits output.
#   lab_ref  : VMEM (B, 1)        int32 labels (as a column)
#   x_ref    : VMEM (B, HIDDEN)
#   w1t_ref  : VMEM (HIDDEN, HIDDEN)   converter weight, pre-transposed (in, out)
#   bias_ref : VMEM (2, NC_PAD)        row 0 lanes[:HIDDEN] = converter bias b1,
#                                      row 1                 = class bias b2 (padded)
#   w2tn_ref : VMEM (HIDDEN, NC_PAD)   class weight, L2-normalized rows, transposed,
#                                      columns >= N_CLASS are zero
#   out_ref  : VMEM (B, NC_PAD)        logits (padded lanes are garbage, sliced away)
# =============================================================================
def bce_kernel(lab_ref, x_ref, w1t_ref, bias_ref, w2tn_ref, out_ref):
    b1 = bias_ref[0:1, 0:HIDDEN]     # (1, HIDDEN)
    b2 = bias_ref[1:2, :]            # (1, NC_PAD)

    # converter: feat = x @ W1^T + b1   (MXU)
    feat = jnp.dot(x_ref[...], w1t_ref[...],
                   preferred_element_type=jnp.float32) + b1

    # F.normalize(feat) semantics: feat / max(||feat||, EPS).
    # rsqrt on the clamped *squared* norm (valid since sumsq >= 0); the per-row
    # scale is deferred past the matmul so both MXU pushes issue back-to-back.
    sumsq = jnp.sum(feat * feat, axis=-1, keepdims=True)        # (B, 1)
    inv = lax.rsqrt(jnp.maximum(sumsq, EPS * EPS))              # (B, 1)

    # cosine = (feat / ||feat||) @ Wn^T  ==  (feat @ Wn^T) * inv   (MXU)
    cosine = jnp.dot(feat, w2tn_ref[...],
                     preferred_element_type=jnp.float32) * inv   # (B, NC_PAD)

    # g(x) = 2*((x+1)/2)^3 - 1   (t = 3)
    h = (cosine + 1.0) * 0.5
    g = 2.0 * h * h * h - 1.0

    # gt[i, c] = (labels[i] == c): single broadcast compare against class-id iota.
    # A label >= N_CLASS only matches padded lanes, which the wrapper slices away
    # (identical to the reference's extra-class column that is dropped).
    class_ids = lax.broadcasted_iota(jnp.int32, (B, NC_PAD), 1)
    gt_f = (lab_ref[...] == class_ids).astype(jnp.float32)       # (B,1)==(B,NC_PAD)

    # masked margin:  gt -> r*(g - m),  ~gt -> r*(g + m);  then + class bias.
    out_ref[...] = R * (g + M * (1.0 - 2.0 * gt_f)) + b2


# =============================================================================
# BCE_module.forward equivalent
# =============================================================================
def bce_module_forward(params, x, labels):
    vmem = pl.BlockSpec(memory_space=pltpu.MemorySpace.VMEM)

    logits_pad = pl.pallas_call(
        bce_kernel,
        out_shape=jax.ShapeDtypeStruct((B, NC_PAD), jnp.float32),
        in_specs=[vmem, vmem, vmem, vmem, vmem],
        out_specs=vmem,
    )(labels.astype(jnp.int32).reshape(B, 1), x,
      params["w1_t"], params["bias_pack"], params["w2t_norm"])

    cosine = logits_pad[:, :N_CLASS]
    # gt is trivially recomputable from labels; no need to ship it out of the kernel.
    gt = labels[:, None] == jnp.arange(N_CLASS, dtype=labels.dtype)[None, :]
    return cosine, gt


def init_params(key):
    """Mirrors BCE_module.__init__; all layout prep (transpose / L2-normalize /
    pad / bias packing) happens here once, so the per-call path has zero XLA
    glue before the kernel beyond the (B,1) label reshape."""
    # converter: nn.Linear(hidden, hidden), eye weight / zero bias (reference init),
    # stored pre-transposed as (in, out).
    w1 = jnp.eye(HIDDEN, dtype=jnp.float32)
    w1_t = w1.T
    b1 = jnp.zeros((HIDDEN,), jnp.float32)
    # class head: weight ~ N(0, 0.01), bias zeros.
    w2 = 0.01 * jax.random.normal(key, (N_CLASS, HIDDEN), jnp.float32)
    b2 = jnp.zeros((N_CLASS,), jnp.float32)
    # Pre-normalize rows (F.normalize) and pre-transpose; zero-pad to NC_PAD lanes.
    w2n = w2 / jnp.maximum(
        jnp.sqrt(jnp.sum(w2 * w2, axis=-1, keepdims=True)), EPS)
    w2t_norm = jnp.zeros((HIDDEN, NC_PAD), jnp.float32).at[:, :N_CLASS].set(w2n.T)
    # Pack both biases into one lane-dense buffer (one fewer input DMA).
    bias_pack = (jnp.zeros((2, NC_PAD), jnp.float32)
                 .at[0, :HIDDEN].set(b1)
                 .at[1, :N_CLASS].set(b2))
    return {"w1_t": w1_t, "bias_pack": bias_pack, "w2t_norm": w2t_norm,
            # raw params kept only for the pure-JAX reference check below
            "w1": w1, "b1": b1, "w2": w2, "b2": b2}


# ---- pure-JAX reference of the PyTorch forward (for a correctness check) ----
def _ref_forward(params, x, labels):
    feat = jnp.dot(x, params["w1"].T,
                   precision=lax.Precision.HIGHEST) + params["b1"][None, :]
    fn = feat / jnp.maximum(
        jnp.sqrt(jnp.sum(feat * feat, -1, keepdims=True)), EPS)
    w2 = params["w2"]
    wn = w2 / jnp.maximum(jnp.sqrt(jnp.sum(w2 * w2, -1, keepdims=True)), EPS)
    cos = jnp.dot(fn, wn.T, precision=lax.Precision.HIGHEST)
    g = 2.0 * ((cos + 1.0) * 0.5) ** T - 1.0
    gt = labels[:, None] == jnp.arange(N_CLASS)[None, :]
    logits = R * (g + jnp.where(gt, -M, M)) + params["b2"][None, :]
    return logits, gt


if __name__ == "__main__":
    key = jax.random.PRNGKey(0)
    kp, kx = jax.random.split(key)
    params = init_params(kp)

    x = jax.random.normal(kx, (B, HIDDEN), jnp.float32)
    labels = jnp.array([1, 9], dtype=jnp.int32)   # 9 >= N_CLASS -> all-False gt row

    cosine, gt = bce_module_forward(params, x, labels)
    jax.block_until_ready((cosine, gt))

    assert cosine.shape == (B, N_CLASS) and cosine.dtype == jnp.float32
    assert gt.shape == (B, N_CLASS) and gt.dtype == jnp.bool_

    ref_logits, ref_gt = _ref_forward(params, x, labels)
    assert bool(jnp.all(gt == ref_gt))
    assert bool(jnp.allclose(cosine, ref_logits, atol=1e-2, rtol=0.0))

    print("KERNEL_OK")
</pallas_src>

<mosaic_0001>
module attributes {stable_mosaic.version = 11 : i64} {
  func.func @bce_kernel(%arg0: memref<2x1xi32, #tpu.memory_space<vmem>>, %arg1: memref<2x32xf32, #tpu.memory_space<vmem>>, %arg2: memref<32x32xf32, #tpu.memory_space<vmem>>, %arg3: memref<2x128xf32, #tpu.memory_space<vmem>>, %arg4: memref<32x128xf32, #tpu.memory_space<vmem>>, %arg5: memref<2x128xf32, #tpu.memory_space<vmem>>) attributes {dimension_semantics = [], scalar_prefetch = 0 : i64, scratch_operands = 0 : i64, tpu.core_type = #tpu.core_type<tc>} {
    %c0 = arith.constant 0 : index
    %c0_0 = arith.constant 0 : index
    %0 = vector.load %arg3[%c0, %c0_0] : memref<2x128xf32, #tpu.memory_space<vmem>>, vector<1x32xf32>
    %c1 = arith.constant 1 : index
    %c0_1 = arith.constant 0 : index
    %1 = vector.load %arg3[%c1, %c0_1] : memref<2x128xf32, #tpu.memory_space<vmem>>, vector<1x128xf32>
    %c0_2 = arith.constant 0 : index
    %c0_3 = arith.constant 0 : index
    %2 = vector.load %arg1[%c0_2, %c0_3] : memref<2x32xf32, #tpu.memory_space<vmem>>, vector<2x32xf32>
    %c0_4 = arith.constant 0 : index
    %c0_5 = arith.constant 0 : index
    %3 = vector.load %arg2[%c0_4, %c0_5] : memref<32x32xf32, #tpu.memory_space<vmem>>, vector<32x32xf32>
    %cst = arith.constant dense<0.000000e+00> : vector<2x32xf32>
    %4 = tpu.matmul %2, %3, %cst {dimension_numbers = #tpu.dot_dimension_numbers<[1], [0], [0], [1], [0, 0, 1, 1], [], []>} : vector<2x32xf32>, vector<32x32xf32>, vector<2x32xf32> -> vector<2x32xf32>
    %5 = vector.broadcast %0 : vector<1x32xf32> to vector<2x32xf32>
    %6 = arith.addf %4, %5 : vector<2x32xf32>
    %7 = arith.mulf %6, %6 : vector<2x32xf32>
    %cst_6 = arith.constant dense<0.000000e+00> : vector<2xf32>
    %8 = vector.multi_reduction <add>, %7, %cst_6 [1] : vector<2x32xf32> to vector<2xf32>
    %9 = vector.shape_cast %8 : vector<2xf32> to vector<2x1xf32>
    %cst_7 = arith.constant 1.000000e-24 : f32
    %10 = vector.broadcast %cst_7 : f32 to vector<2x1xf32>
    %11 = arith.maximumf %9, %10 : vector<2x1xf32>
    %12 = math.rsqrt %11 : vector<2x1xf32>
    %c0_8 = arith.constant 0 : index
    %c0_9 = arith.constant 0 : index
    %13 = vector.load %arg4[%c0_8, %c0_9] : memref<32x128xf32, #tpu.memory_space<vmem>>, vector<32x128xf32>
    %cst_10 = arith.constant dense<0.000000e+00> : vector<2x128xf32>
    %14 = tpu.matmul %6, %13, %cst_10 {dimension_numbers = #tpu.dot_dimension_numbers<[1], [0], [0], [1], [0, 0, 1, 1], [], []>} : vector<2x32xf32>, vector<32x128xf32>, vector<2x128xf32> -> vector<2x128xf32>
    %15 = vector.broadcast %12 : vector<2x1xf32> to vector<2x128xf32>
    %16 = arith.mulf %14, %15 : vector<2x128xf32>
    %cst_11 = arith.constant 1.000000e+00 : f32
    %17 = vector.broadcast %cst_11 : f32 to vector<2x128xf32>
    %18 = arith.addf %16, %17 : vector<2x128xf32>
    %cst_12 = arith.constant 5.000000e-01 : f32
    %19 = vector.broadcast %cst_12 : f32 to vector<2x128xf32>
    %20 = arith.mulf %18, %19 : vector<2x128xf32>
    %cst_13 = arith.constant 2.000000e+00 : f32
    %21 = vector.broadcast %cst_13 : f32 to vector<2x128xf32>
    %22 = arith.mulf %21, %20 : vector<2x128xf32>
    %23 = arith.mulf %22, %20 : vector<2x128xf32>
    %24 = arith.mulf %23, %20 : vector<2x128xf32>
    %cst_14 = arith.constant 1.000000e+00 : f32
    %25 = vector.broadcast %cst_14 : f32 to vector<2x128xf32>
    %26 = arith.subf %24, %25 : vector<2x128xf32>
    %27 = tpu.iota {dimensions = array<i32: 1>} : vector<2x128xi32>
    %c0_15 = arith.constant 0 : index
    %c0_16 = arith.constant 0 : index
    %28 = vector.load %arg0[%c0_15, %c0_16] : memref<2x1xi32, #tpu.memory_space<vmem>>, vector<2x1xi32>
    %29 = vector.broadcast %28 : vector<2x1xi32> to vector<2x128xi32>
    %30 = arith.cmpi eq, %29, %27 : vector<2x128xi32>
    %31 = arith.extui %30 : vector<2x128xi1> to vector<2x128xi32>
    %32 = arith.sitofp %31 : vector<2x128xi32> to vector<2x128xf32>
    %cst_17 = arith.constant 2.000000e+00 : f32
    %33 = vector.broadcast %cst_17 : f32 to vector<2x128xf32>
    %34 = arith.mulf %33, %32 : vector<2x128xf32>
    %cst_18 = arith.constant 1.000000e+00 : f32
    %35 = vector.broadcast %cst_18 : f32 to vector<2x128xf32>
    %36 = arith.subf %35, %34 : vector<2x128xf32>
    %cst_19 = arith.constant 4.000000e-01 : f32
    %37 = vector.broadcast %cst_19 : f32 to vector<2x128xf32>
    %38 = arith.mulf %37, %36 : vector<2x128xf32>
    %39 = arith.addf %26, %38 : vector<2x128xf32>
    %cst_20 = arith.constant 3.000000e+01 : f32
    %40 = vector.broadcast %cst_20 : f32 to vector<2x128xf32>
    %41 = arith.mulf %40, %39 : vector<2x128xf32>
    %42 = vector.broadcast %1 : vector<1x128xf32> to vector<2x128xf32>
    %43 = arith.addf %41, %42 : vector<2x128xf32>
    %c0_21 = arith.constant 0 : index
    %c0_22 = arith.constant 0 : index
    %44 = vector.load %arg5[%c0_21, %c0_22] : memref<2x128xf32, #tpu.memory_space<vmem>>, vector<2x128xf32>
    tpu.vector_store %arg5[%c0_21, %c0_22], %43 {strides = array<i32>} : memref<2x128xf32, #tpu.memory_space<vmem>>, vector<2x128xf32>,
    return
  }
}

</mosaic_0001>

<bundles_post_ra>
// kernel: tpu_custom_call.1
= control target key start
LH: loop header
LB: loop body
LE: loop exit
PB: predicated region body
PF: predicated region fallthrough
CT: control target
= control target key end

     0   :  { %10 = vsyncpa [#allocation3], 0  ;;  %s482_s0 = inlined_call_operand.vmem [shape: s32[2,1], index: 0, kind: input, shape index: {}]   ;;  %s483_s1 = inlined_call_operand.vmem [shape: f32[2,32], index: 1, kind: input, shape index: {}]   ;;  %s484_s2 = inlined_call_operand.hbm [shape: f32[32,32], index: 2, kind: input, shape index: {}]   ;;  %s485_s3 = inlined_call_operand.vmem [shape: f32[2,128], index: 3, kind: input, shape index: {}]   ;;  %s486_s4 = inlined_call_operand.hbm [shape: f32[32,128], index: 4, kind: input, shape index: {}]   ;;  %s487_s5 = inlined_call_operand.hbm [shape: f32[2,128], index: 5, kind: output, shape index: {}]  }
   0x1   :  { %11 = vsyncpa [#allocation6], 0 }
   0x2   :  { %12 = vsyncpa [#allocation4], 0  ;;  %s395_s18 = smov [#allocation2]   ;;  %s323_s22 = scalar_lea.hbm %s484_s2, 512 }
   0x3   :  { %s22_s19 = sshll.u32 %s395_s18, 4  ;;  %p324_p0 = scmp.ne.s32.totalorder %s484_s2, %s323_s22  ;;  %s23_s19 = int_to_ptr.vmem [resolvable:$true] %s22_s19 }
   0x4   :  { %p327_p1 = scmp.lt.u32.totalorder %s323_s22, %s484_s2 }
   0x6   :  { %p329_p2 = pnand %p327_p1, %p324_p0 }
   0x8   :  { %332 = shalt.err (!%p329_p2)
}
   0x9   :  { %s333_s27 = scalar_lea.vmem %s23_s19, 512  ;;  %p338_p4 = scmp.lt.s32.totalorder %s23_s19, %s23_s19 }
   0xa   :  { %p334_p3 = scmp.ne.s32.totalorder %s23_s19, %s333_s27  ;;  %p339_p5 = scmp.lt.s32.totalorder %s333_s27, %s333_s27 }
   0xc   :  { %p340_p6 = por %p339_p5, %p338_p4 }
   0xe   :  { %p341_p7 = pnand %p340_p6, %p334_p3 }
  0x10   :  { %344 = shalt.err (!%p341_p7)
}
  0x11   :  { %s396_s28 = smov 128   ;;  %s397_s29 = smov 8  }
  0x12   :  { %28 = dma.hbm_to_vmem [thread:$0]  %s484_s2, 512, %s23_s19, [#allocation3], %s396_s28, %s396_s28, %s397_s29  }
  0x13   :  { %s398_s7 = smov [#allocation5]   ;;  %s345_s11 = scalar_lea.hbm %s486_s4, 512 }
  0x14   :  { %s36_s8 = sshll.u32 %s398_s7, 4  ;;  %p346_p8 = scmp.ne.s32.totalorder %s486_s4, %s345_s11  ;;  %s37_s8 = int_to_ptr.vmem [resolvable:$true] %s36_s8 }
  0x15   :  { %p349_p9 = scmp.lt.u32.totalorder %s345_s11, %s486_s4 }
  0x17   :  { %p351_p10 = pnand %p349_p9, %p346_p8 }
  0x19   :  { %354 = shalt.err (!%p351_p10)
}
  0x1a   :  { %s355_s16 = scalar_lea.vmem %s37_s8, 512  ;;  %p360_p12 = scmp.lt.s32.totalorder %s37_s8, %s37_s8 }
  0x1b   :  { %p356_p11 = scmp.ne.s32.totalorder %s37_s8, %s355_s16  ;;  %p361_p13 = scmp.lt.s32.totalorder %s355_s16, %s355_s16 }
  0x1d   :  { %p362_p0 = por %p361_p13, %p360_p12 }
  0x1f   :  { %p363_p1 = pnand %p362_p0, %p356_p11 }
  0x21   :  { %366 = shalt.err (!%p363_p1)
}
  0x22   :  { %42 = dma.hbm_to_vmem [thread:$0]  %s486_s4, 512, %s37_s8, [#allocation6], %s396_s28, %s396_s28, %s397_s29  }
  0x23   :  { %389 = dma.done.wait [#allocation3], 512  }
  0x24   :  { %390 = vsyncadd [#allocation3], 4294966784 }
  0x25   :  { %391 = dma.done.wait [#allocation6], 512  }
  0x26   :  { %392 = vsyncadd [#allocation6], 4294966784  ;;  %v399_v0 = vmov 0.0|0.0   ;;  %vm400_vm0 = vmmov 0   ;;  %v401_v1 = vmov 0.0   ;;  %v52_v2 = vld [vmem:[#allocation2] sm:$0xff]  ;;  %v225_v25 = vlaneseq }
  0x27   :  { %299 = vmatprep.subr.bf16.mxu0 %v399_v0  ;;  %285 = vmatprep.mubr.msk.f32.mxu0 %vm400_vm0, %v401_v1  ;;  %v53_v3 = vld [vmem:[#allocation2 + $0x8] sm:$0xff]  ;;  %v54_v4 = vld [vmem:[#allocation2 + $0x10] sm:$0xff]  ;;  %v55_v6 = vld [vmem:[#allocation2 + $0x18] sm:$0xff]  ;;  %vm60_vm1 = vcmask 261120   ;;  %v402_v15 = vmov 0   ;;  %vm135_vm2 = vcmask 254976  }
  0x28   :  { %305 = vmatprep.subr.bf16.mxu1 %v399_v0  ;;  %296 = vmatprep.mubr.msk.f32.mxu1 %vm400_vm0, %v401_v1  ;;  %v300_v5 = vpack.c.bf16 %v53_v3, %v52_v2  ;;  %v141_v7 = vld [vmem:[#allocation5] sm:$0xff]  ;;  %v142_v8 = vld [vmem:[#allocation5 + $0x8] sm:$0xff]  ;;  %v303_v9 = vpack.c.bf16 %v55_v6, %v54_v4  ;;  %v51_v11 = vld [vmem:[%s483_s1] sm:$0x3]  ;;  %v226_v26 = vand.u32 127, %v225_v25  ;;  %s403_s23 = smov [#allocation7]  }
  0x29   :  { %v306_v10 = vpack.c.bf16 %v142_v8, %v141_v7  ;;  %v143_v12 = vld [vmem:[#allocation5 + $0x10] sm:$0xff]  ;;  %v144_v13 = vld [vmem:[#allocation5 + $0x18] sm:$0xff]  ;;  %320 = vset.pattern.permute.xlu0 %v402_v15  ;;  %s251_s24 = sshll.u32 %s403_s23, 4  ;;  %s252_s24 = int_to_ptr.vmem [resolvable:$true] %s251_s24 }
  0x2a   :  { %301 = vmatpush3.bf16.msra.mxu0 %v300_v5  ;;  %v309_v14 = vpack.c.bf16 %v144_v13, %v143_v12  ;;  %v261_v16 = vld [vmem:[%s485_s3] ss:$0 sm:$0xff]  ;;  %v266_v43 = vld [vmem:[%s485_s3 + $0x1] ss:$0 sm:$0xff]  ;;  %s367_s25 = scalar_lea.vmem %s252_s24, 32  ;;  %p372_p3 = scmp.lt.s32.totalorder %s252_s24, %s252_s24 }
  0x2b   :  { %302 = vmatprep.subr.bf16.mxu0 %v399_v0  ;;  %307 = vmatpush3.bf16.msra.mxu1 %v306_v10  ;;  %v227_v22 = vld [vmem:[%s482_s0] sm:$0x3]  ;;  %p368_p2 = scmp.ne.s32.totalorder %s252_s24, %s367_s25  ;;  %p373_p4 = scmp.lt.s32.totalorder %s367_s25, %s367_s25 }
  0x2c   :  { %308 = vmatprep.subr.bf16.mxu1 %v399_v0 }
  0x2d   :  { %p374_p5 = por %p373_p4, %p372_p3 }
  0x2e   :  { %304 = vmatpush3.bf16.msra.mxu0 %v303_v9 }
  0x2f   :  { %310 = vmatpush3.bf16.msra.mxu1 %v309_v14  ;;  %p375_p6 = pnand %p374_p5, %p368_p2 }
  0x31   :  { %286 = vmatmul.mubr.msk.f32.vlgmr.msra.gmra.mrb[0].mxu0 %vm60_vm1, %v51_v11 }
 0x104   :  { %v130_v17 = vpop.f32.mrb[0].mxu0 }
 0x105   :  { %v131_v18 = vadd.f32 %v261_v16, %v130_v17  ;;  %v287_v19 = vpop.f32.mrb[1].mxu0 }
 0x107   :  { %297 = vmatmul.mubr.msk.f32.vlgmr.msra.gmra.mrb[0].mxu1 %vm60_vm1, %v131_v18  ;;  %v134_v20 = vmul.f32 %v131_v18, %v131_v18 }
 0x109   :  { %v136_v21 = vsel %vm135_vm2, %v134_v20, 0.0 }
 0x10a   :  { %137 = vadd.xlane.f32.xlu0 %v136_v21 }
 0x120   :  { %229 = vperm.xlu0 %320, %v227_v22  }
 0x197   :  { %v138_v23 = vpop.xlane.xlu0 %137 }
 0x198   :  { %v139_v24 = vmax.f32 %v138_v23, 1e-24 }
 0x19a   :  { %321 = vrsqrt.f32 %v139_v24 }
 0x19f   :  { %v230_v27 = vpop.permute.xlu0 %229 }
 0x1a0   :  { %vm231_vm3 = vcmp.eq.s32.totalorder %v230_v27, %v226_v26 }
 0x1a1   :  { %v265_v30 = vsel %vm231_vm3, 1.0, %v401_v1 }
 0x1a2   :  { %v234_v34 = vmul.f32 2.0, %v265_v30 }
 0x1a4   :  { %v322_v28 = vpop.eup %321  ;;  %v235_v37 = vsub.f32 1.0, %v234_v34 }
 0x1a6   :  { %v236_v40 = vmul.f32 0.4, %v235_v37 }
 0x1da   :  { %v214_v29 = vpop.f32.mrb[0].mxu1 }
 0x1db   :  { %v218_v31 = vmul.f32 %v322_v28, %v214_v29  ;;  %v298_v32 = vpop.f32.mrb[1].mxu1 }
 0x1dd   :  { %v219_v33 = vadd.f32 1.0, %v218_v31 }
 0x1df   :  { %v220_v35 = vmul.f32 0.5, %v219_v33 }
 0x1e1   :  { %v221_v36 = vmul.f32 2.0, %v220_v35 }
 0x1e3   :  { %v222_v38 = vmul.f32 %v221_v36, %v220_v35 }
 0x1e5   :  { %v223_v39 = vmul.f32 %v222_v38, %v220_v35 }
 0x1e7   :  { %v264_v41 = vadd.f32 -1.0, %v223_v39 }
 0x1e9   :  { %v237_v42 = vadd.f32 %v264_v41, %v236_v40 }
 0x1eb   :  { %v238_v44 = vmul.f32 30.0, %v237_v42 }
 0x1ed   :  { %v243_v45 = vadd.f32 %v266_v43, %v238_v44 }
 0x1ef   :  { %244 = vst [vmem:[#allocation7] sm:$0x3] %v243_v45 }
 0x1f0   :  { %378 = shalt.err (!%p375_p6)
}
 0x1f1   :  { %s379_s28 = scalar_lea.hbm %s487_s5, 32 }
 0x1f2   :  { %p380_p7 = scmp.ne.s32.totalorder %s487_s5, %s379_s28  ;;  %p383_p8 = scmp.lt.u32.totalorder %s379_s28, %s487_s5 }
 0x1f4   :  { %p385_p9 = pnand %p383_p8, %p380_p7 }
 0x1f6   :  { %388 = shalt.err (!%p385_p9)
}
 0x1f7   :  { %254 = dma.vmem_to_hbm [thread:$0]  %s252_s24, 32, %s487_s5, [#allocation4]  }
 0x1f8   :  { %393 = dma.done.wait [#allocation4], 32  }
 0x1f9   :  { %394 = vsyncadd [#allocation4], 4294967264 }
 0x1fa   :  { %258 = vsyncpa [#allocation3], 1 }
 0x1fb   :  { %259 = vsyncpa [#allocation6], 1 }
 0x1fc   :  { %260 = vsyncpa [#allocation4], 1 }

</bundles_post_ra>
